<compile_context>
chip_gen: v6e
topology: v6e:2x2x1
jax: 0.10.0
libtpu: 0.0.40
codegen_flags: <defaults>
</compile_context>

<pallas_src>
import functools

import jax
import jax.numpy as jnp
from jax.experimental import pallas as pl
from jax.experimental.pallas import tpu as pltpu

SMOOTH = 1e-6
LANES = 128
SUBLANES = 8


def _round_up(v, m):
    return ((v + m - 1) // m) * m


def _tile_plan(s_rows, num_labels, x_itemsize, y_itemsize):
    """Chunk rows / chunk count / VMEM limit from real wire dtypes + device VMEM."""
    try:
        vmem_cap = int(pltpu.get_tpu_info().vmem_capacity_bytes)
    except Exception:  # interpret mode / unknown device
        vmem_cap = 128 * 1024 * 1024
    # Budget for the double-buffered input blocks: 3/8 of physical VMEM, capped
    # at 48 MiB -> 48 MiB on 128-MiB v5e/v6e, 24 MiB on 64-MiB-per-core v7x.
    block_budget = min(vmem_cap * 3 // 8, 48 * 1024 * 1024)
    # Bytes per row of 128 lanes, double-buffered: L planes of x (wire dtype) + y.
    bytes_per_row = 2 * (num_labels * x_itemsize + y_itemsize) * LANES
    max_rows = max(SUBLANES,
                   (block_budget // bytes_per_row) // SUBLANES * SUBLANES)
    if s_rows <= max_rows:
        rows, num_chunks = s_rows, 1          # single chunk == full extent (always legal)
    else:
        num_chunks = pl.cdiv(s_rows, max_rows)
        rows = _round_up(pl.cdiv(s_rows, num_chunks), SUBLANES)
    vmem_limit = min(vmem_cap, block_budget + (8 << 20))
    return rows, num_chunks, vmem_limit


def _jaccard_sums_kernel(pv_ref, x_ref, y_ref, inter_ref, total_ref, *, hw, tail):
    """Per-(batch, chunk) partial reductions for all labels at once.

    pv_ref    : VMEM [L, 1, 128] int32   label -> pixel value, lane-replicated
    x_ref     : VMEM [L, rows, 128]      predictions for all labels (wire dtype)
    y_ref     : VMEM [rows, 128] int     target pixel labels, one chunk
    inter_ref : VMEM [L, 128] f32        accum of sum(pred * mask)        per lane
    total_ref : VMEM [L, 128] f32        accum of sum(pred) + sum(mask)   per lane
    """
    rows = x_ref.shape[1]
    c = pl.program_id(1)

    @pl.when(c == 0)
    def _init():
        inter_ref[...] = jnp.zeros_like(inter_ref)
        total_ref[...] = jnp.zeros_like(total_ref)

    preds = x_ref[...].astype(jnp.float32)                              # [L, rows, 128]
    match = y_ref[...].astype(jnp.int32)[None, :, :] == pv_ref[...]     # [L, rows, 128]

    def _accumulate(match_m, preds_m):
        # Intersection: pred where the label matches.
        inter_ref[...] += jnp.sum(jnp.where(match_m, preds_m, 0.0), axis=1)
        # Fused total: pred + 1 on matches, pred elsewhere
        # (== sum(pred) + count(match); counts exact in f32 up to 2^24 per lane).
        total_ref[...] += jnp.sum(jnp.where(match_m, preds_m + 1.0, preds_m), axis=1)

    if tail:
        last = pl.num_programs(1) - 1

        @pl.when(c != last)
        def _full_chunk():
            _accumulate(match, preds)

        @pl.when(c == last)
        def _partial_chunk():
            # Mask elements whose flat spatial index is >= H*W (Pallas block
            # padding plus the <128-element 128-alignment pad); the where-select
            # also squashes any NaN garbage in the padded region.
            rem = hw - c * (rows * LANES)
            rid = jax.lax.broadcasted_iota(jnp.int32, (rows, LANES), 0)
            lid = jax.lax.broadcasted_iota(jnp.int32, (rows, LANES), 1)
            valid = (rid * LANES + lid) < rem                            # [rows, 128]
            _accumulate(jnp.logical_and(match, valid[None]),
                        jnp.where(valid[None], preds, 0.0))
    else:
        _accumulate(match, preds)


@functools.partial(jax.jit, static_argnames=("num_labels",))
def jaccard_loss(x, y, pixel_values, num_labels):
    """x: [B, C, H, W] float, y: [B, H, W] int, pixel_values: [L] int."""
    B, C, H, W = x.shape
    L = num_labels
    assert C >= L, "model output must have at least one plane per label"
    HW = H * W

    # Keep the caller's narrow integer mask dtype on the wire (widened in-kernel);
    # only unsupported dtypes are converted.
    if not any(y.dtype == d for d in (jnp.int8, jnp.uint8, jnp.int16,
                                      jnp.uint16, jnp.int32, jnp.uint32)):
        y = y.astype(jnp.int32)

    # View the spatial plane as [S, 128] lane-dense rows. Free (no-copy) reshape
    # when H*W is a multiple of 128; otherwise pad minimally (<128 elements).
    pad = (-HW) % LANES
    if pad:
        # TODO(synk): this materializes a padded copy in HBM; only taken when
        # H*W is not 128-aligned. The padded tail is masked out in-kernel.
        x = jnp.pad(x.reshape(B, C, HW), ((0, 0), (0, 0), (0, pad)))
        y = jnp.pad(y.reshape(B, HW), ((0, 0), (0, pad)))
    S = (HW + pad) // LANES
    x4 = x.reshape(B, C, S, LANES)
    y3 = y.reshape(B, S, LANES)

    rows, num_chunks, vmem_limit = _tile_plan(S, L, x.dtype.itemsize,
                                              y3.dtype.itemsize)
    tail = num_chunks * rows * LANES > HW      # only the last chunk can be partial

    pv = jnp.broadcast_to(
        pixel_values.astype(jnp.int32).reshape(L, 1, 1), (L, 1, LANES))

    kernel = functools.partial(_jaccard_sums_kernel, hw=HW, tail=tail)

    inter_lanes, total_lanes = pl.pallas_call(
        kernel,
        out_shape=(
            jax.ShapeDtypeStruct((B, L, LANES), jnp.float32),
            jax.ShapeDtypeStruct((B, L, LANES), jnp.float32),
        ),
        grid=(B, num_chunks),
        in_specs=[
            pl.BlockSpec((L, 1, LANES), lambda b, c: (0, 0, 0)),
            # Selecting the first L of C planes via the BlockSpec avoids a
            # wrapper-side x[:, :L] slice copy when C > L.
            pl.BlockSpec((None, L, rows, LANES), lambda b, c: (b, 0, c, 0)),
            pl.BlockSpec((None, rows, LANES), lambda b, c: (b, c, 0)),
        ],
        out_specs=[
            pl.BlockSpec((None, L, LANES), lambda b, c: (b, 0, 0)),
            pl.BlockSpec((None, L, LANES), lambda b, c: (b, 0, 0)),
        ],
        compiler_params=pltpu.CompilerParams(
            dimension_semantics=("parallel", "arbitrary"),
            vmem_limit_bytes=vmem_limit,
        ),
    )(pv, x4, y3)

    # Tiny final reductions + IoU math in plain JAX.
    inter = jnp.sum(inter_lanes, axis=-1)          # [B, L]
    total = jnp.sum(total_lanes, axis=-1)          # [B, L]
    union = total - inter
    iou = (inter + SMOOTH) / (union + SMOOTH)      # [B, L]
    miou = jnp.sum(jnp.mean(iou, axis=0)) / num_labels
    return 1.0 - miou


def _reference_jaccard_loss(x, y, pixel_values):
    """Pure-JAX reference mirroring the (intended) PyTorch forward."""
    losses = []
    for i in range(pixel_values.shape[0]):
        pred = x[:, i, :, :].astype(jnp.float32)
        mask = (y == pixel_values[i]).astype(jnp.float32)
        inter = jnp.sum(pred * mask, axis=(1, 2))
        union = jnp.sum(pred + mask, axis=(1, 2)) - inter
        iou = (inter + SMOOTH) / (union + SMOOTH)
        losses.append(jnp.mean(iou))
    return 1.0 - sum(losses) / len(losses)


if __name__ == "__main__":
    # Deterministic synthetic setup (mirrors __init__(labels, labels_to_pixels)).
    labels = ["bg", "road", "car", "person"]
    labels_to_pixels = {"bg": 0, "road": 1, "car": 2, "person": 3}
    pixel_values = jnp.array([labels_to_pixels[l] for l in labels], dtype=jnp.int32)

    key = jax.random.PRNGKey(0)
    k1, k2, k3, k4 = jax.random.split(key, 4)

    # Case 1: nominal shapes (H*W multiple of 128 -> fully copy-free wrapper path).
    B, C, H, W = 2, 4, 16, 16
    x1 = jax.nn.softmax(jax.random.normal(k1, (B, C, H, W), jnp.float32), axis=1)
    y1 = jax.random.randint(k2, (B, H, W), 0, C, dtype=jnp.int32)
    loss1 = jax.block_until_ready(jaccard_loss(x1, y1, pixel_values,
                                               num_labels=len(labels)))
    ref1 = _reference_jaccard_loss(x1, y1, pixel_values)
    assert jnp.allclose(loss1, ref1, rtol=1e-5, atol=1e-5), (loss1, ref1)

    # Case 2: C > L and H*W not 128-aligned -> exercises the in-kernel tail mask
    # and the BlockSpec prefix-plane selection.
    B2, C2, H2, W2 = 2, 5, 17, 19
    x2 = jax.nn.softmax(jax.random.normal(k3, (B2, C2, H2, W2), jnp.float32), axis=1)
    y2 = jax.random.randint(k4, (B2, H2, W2), 0, len(labels), dtype=jnp.int32)
    loss2 = jax.block_until_ready(jaccard_loss(x2, y2, pixel_values,
                                               num_labels=len(labels)))
    ref2 = _reference_jaccard_loss(x2, y2, pixel_values)
    assert jnp.allclose(loss2, ref2, rtol=1e-5, atol=1e-5), (loss2, ref2)

    print("KERNEL_OK")
</pallas_src>

<mosaic_0001>
module attributes {stable_mosaic.version = 11 : i64} {
  func.func @_jaccard_sums_kernel(%arg0: i32, %arg1: i32, %arg2: memref<4x1x128xi32, #tpu.memory_space<vmem>>, %arg3: memref<1x4x2x128xf32, #tpu.memory_space<vmem>>, %arg4: memref<1x2x128xi32, #tpu.memory_space<vmem>>, %arg5: memref<1x4x128xf32, #tpu.memory_space<vmem>>, %arg6: memref<1x4x128xf32, #tpu.memory_space<vmem>>) attributes {dimension_semantics = [#tpu.dimension_semantics<parallel>, #tpu.dimension_semantics<arbitrary>], iteration_bounds = array<i64: 2, 1>, scalar_prefetch = 0 : i64, scratch_operands = 0 : i64, tpu.core_type = #tpu.core_type<tc>, window_params = [{pipeline_mode = #tpu.pipeline_mode<synchronous>, transform_indices = @transform_0, window_bounds = array<i64: 4, 1, 128>}, {transform_indices = @transform_1, window_bounds = array<i64: 1, 4, 2, 128>}, {transform_indices = @transform_2, window_bounds = array<i64: 1, 2, 128>}, {transform_indices = @transform_3, window_bounds = array<i64: 1, 4, 128>}, {transform_indices = @transform_4, window_bounds = array<i64: 1, 4, 128>}]} {
    %c0_i32 = arith.constant 0 : i32
    %0 = arith.cmpi eq, %arg1, %c0_i32 : i32
    %1 = arith.extui %0 : i1 to i32
    %c0_i32_0 = arith.constant 0 : i32
    %2 = arith.cmpi ne, %1, %c0_i32_0 : i32
    scf.if %2 {
      %cst_25 = arith.constant 0.000000e+00 : f32
      %31 = vector.broadcast %cst_25 : f32 to vector<4x128xf32>
      %c0_26 = arith.constant 0 : index
      %c0_27 = arith.constant 0 : index
      %c0_28 = arith.constant 0 : index
      %32 = vector.load %arg5[%c0_26, %c0_27, %c0_28] : memref<1x4x128xf32, #tpu.memory_space<vmem>>, vector<1x4x128xf32>
      %33 = vector.shape_cast %32 : vector<1x4x128xf32> to vector<4x128xf32>
      %34 = vector.shape_cast %31 : vector<4x128xf32> to vector<1x4x128xf32>
      tpu.vector_store %arg5[%c0_26, %c0_27, %c0_28], %34 {strides = array<i32>} : memref<1x4x128xf32, #tpu.memory_space<vmem>>, vector<1x4x128xf32>,
      %cst_29 = arith.constant 0.000000e+00 : f32
      %35 = vector.broadcast %cst_29 : f32 to vector<4x128xf32>
      %c0_30 = arith.constant 0 : index
      %c0_31 = arith.constant 0 : index
      %c0_32 = arith.constant 0 : index
      %36 = vector.load %arg6[%c0_30, %c0_31, %c0_32] : memref<1x4x128xf32, #tpu.memory_space<vmem>>, vector<1x4x128xf32>
      %37 = vector.shape_cast %36 : vector<1x4x128xf32> to vector<4x128xf32>
      %38 = vector.shape_cast %35 : vector<4x128xf32> to vector<1x4x128xf32>
      tpu.vector_store %arg6[%c0_30, %c0_31, %c0_32], %38 {strides = array<i32>} : memref<1x4x128xf32, #tpu.memory_space<vmem>>, vector<1x4x128xf32>,
    } else {
    }
    %c0 = arith.constant 0 : index
    %c0_1 = arith.constant 0 : index
    %c0_2 = arith.constant 0 : index
    %c0_3 = arith.constant 0 : index
    %3 = vector.load %arg3[%c0, %c0_1, %c0_2, %c0_3] : memref<1x4x2x128xf32, #tpu.memory_space<vmem>>, vector<1x4x2x128xf32>
    %4 = vector.shape_cast %3 : vector<1x4x2x128xf32> to vector<4x2x128xf32>
    %c0_4 = arith.constant 0 : index
    %c0_5 = arith.constant 0 : index
    %c0_6 = arith.constant 0 : index
    %5 = vector.load %arg4[%c0_4, %c0_5, %c0_6] : memref<1x2x128xi32, #tpu.memory_space<vmem>>, vector<1x2x128xi32>
    %6 = vector.shape_cast %5 : vector<1x2x128xi32> to vector<2x128xi32>
    %7 = vector.shape_cast %6 : vector<2x128xi32> to vector<1x2x128xi32>
    %c0_7 = arith.constant 0 : index
    %c0_8 = arith.constant 0 : index
    %c0_9 = arith.constant 0 : index
    %8 = vector.load %arg2[%c0_7, %c0_8, %c0_9] : memref<4x1x128xi32, #tpu.memory_space<vmem>>, vector<4x1x128xi32>
    %9 = vector.broadcast %7 : vector<1x2x128xi32> to vector<4x2x128xi32>
    %10 = vector.broadcast %8 : vector<4x1x128xi32> to vector<4x2x128xi32>
    %11 = arith.cmpi eq, %9, %10 : vector<4x2x128xi32>
    %c0_10 = arith.constant 0 : index
    %c0_11 = arith.constant 0 : index
    %c0_12 = arith.constant 0 : index
    %12 = vector.load %arg5[%c0_10, %c0_11, %c0_12] : memref<1x4x128xf32, #tpu.memory_space<vmem>>, vector<1x4x128xf32>
    %13 = vector.shape_cast %12 : vector<1x4x128xf32> to vector<4x128xf32>
    %cst = arith.constant 0.000000e+00 : f32
    %14 = vector.broadcast %cst : f32 to vector<4x2x128xf32>
    %15 = arith.select %11, %4, %14 : vector<4x2x128xi1>, vector<4x2x128xf32>
    %cst_13 = arith.constant dense<0.000000e+00> : vector<4x128xf32>
    %16 = vector.multi_reduction <add>, %15, %cst_13 [1] : vector<4x2x128xf32> to vector<4x128xf32>
    %17 = arith.addf %13, %16 : vector<4x128xf32>
    %c0_14 = arith.constant 0 : index
    %c0_15 = arith.constant 0 : index
    %c0_16 = arith.constant 0 : index
    %18 = vector.load %arg5[%c0_14, %c0_15, %c0_16] : memref<1x4x128xf32, #tpu.memory_space<vmem>>, vector<1x4x128xf32>
    %19 = vector.shape_cast %18 : vector<1x4x128xf32> to vector<4x128xf32>
    %20 = vector.shape_cast %17 : vector<4x128xf32> to vector<1x4x128xf32>
    tpu.vector_store %arg5[%c0_14, %c0_15, %c0_16], %20 {strides = array<i32>} : memref<1x4x128xf32, #tpu.memory_space<vmem>>, vector<1x4x128xf32>,
    %c0_17 = arith.constant 0 : index
    %c0_18 = arith.constant 0 : index
    %c0_19 = arith.constant 0 : index
    %21 = vector.load %arg6[%c0_17, %c0_18, %c0_19] : memref<1x4x128xf32, #tpu.memory_space<vmem>>, vector<1x4x128xf32>
    %22 = vector.shape_cast %21 : vector<1x4x128xf32> to vector<4x128xf32>
    %cst_20 = arith.constant 1.000000e+00 : f32
    %23 = vector.broadcast %cst_20 : f32 to vector<4x2x128xf32>
    %24 = arith.addf %4, %23 : vector<4x2x128xf32>
    %25 = arith.select %11, %24, %4 : vector<4x2x128xi1>, vector<4x2x128xf32>
    %cst_21 = arith.constant dense<0.000000e+00> : vector<4x128xf32>
    %26 = vector.multi_reduction <add>, %25, %cst_21 [1] : vector<4x2x128xf32> to vector<4x128xf32>
    %27 = arith.addf %22, %26 : vector<4x128xf32>
    %c0_22 = arith.constant 0 : index
    %c0_23 = arith.constant 0 : index
    %c0_24 = arith.constant 0 : index
    %28 = vector.load %arg6[%c0_22, %c0_23, %c0_24] : memref<1x4x128xf32, #tpu.memory_space<vmem>>, vector<1x4x128xf32>
    %29 = vector.shape_cast %28 : vector<1x4x128xf32> to vector<4x128xf32>
    %30 = vector.shape_cast %27 : vector<4x128xf32> to vector<1x4x128xf32>
    tpu.vector_store %arg6[%c0_22, %c0_23, %c0_24], %30 {strides = array<i32>} : memref<1x4x128xf32, #tpu.memory_space<vmem>>, vector<1x4x128xf32>,
    return
  }
  func.func @transform_0(%arg0: i32, %arg1: i32) -> (i32, i32, i32) {
    %c0_i32 = arith.constant 0 : i32
    %c0_i32_0 = arith.constant 0 : i32
    %c0_i32_1 = arith.constant 0 : i32
    %c0_i32_2 = arith.constant 0 : i32
    return %c0_i32, %c0_i32_0, %c0_i32_1 : i32, i32, i32
  }
  func.func @transform_1(%arg0: i32, %arg1: i32) -> (i32, i32, i32, i32) {
    %c0_i32 = arith.constant 0 : i32
    %c0_i32_0 = arith.constant 0 : i32
    %c0_i32_1 = arith.constant 0 : i32
    return %arg0, %c0_i32, %arg1, %c0_i32_0 : i32, i32, i32, i32
  }
  func.func @transform_2(%arg0: i32, %arg1: i32) -> (i32, i32, i32) {
    %c0_i32 = arith.constant 0 : i32
    %c0_i32_0 = arith.constant 0 : i32
    return %arg0, %arg1, %c0_i32 : i32, i32, i32
  }
  func.func @transform_3(%arg0: i32, %arg1: i32) -> (i32, i32, i32) {
    %c0_i32 = arith.constant 0 : i32
    %c0_i32_0 = arith.constant 0 : i32
    %c0_i32_1 = arith.constant 0 : i32
    return %arg0, %c0_i32, %c0_i32_0 : i32, i32, i32
  }
  func.func @transform_4(%arg0: i32, %arg1: i32) -> (i32, i32, i32) {
    %c0_i32 = arith.constant 0 : i32
    %c0_i32_0 = arith.constant 0 : i32
    %c0_i32_1 = arith.constant 0 : i32
    return %arg0, %c0_i32, %c0_i32_0 : i32, i32, i32
  }
}

</mosaic_0001>

<bundles_post_ra>
// kernel: jaccard_loss.1
= control target key start
LH: loop header
LB: loop body
LE: loop exit
PB: predicated region body
PF: predicated region fallthrough
CT: control target
= control target key end

     0   :  { %s592_s15 = smov 0   ;;  %s594_s16 = smov 0   ;;  %s675_s0 = inlined_call_operand.vmem [shape: s32[4,1,128], index: 0, kind: input, shape index: {}]   ;;  %s676_s1 = inlined_call_operand.vmem [shape: f32[2,4,2,128], index: 1, kind: input, shape index: {}]   ;;  %s677_s2 = inlined_call_operand.vmem [shape: s32[2,2,128], index: 2, kind: input, shape index: {}]   ;;  %s678_s3 = inlined_call_operand.vmem [shape: f32[2,4,128], index: 3, kind: output, shape index: {0}]   ;;  %s679_s4 = inlined_call_operand.vmem [shape: f32[2,4,128], index: 4, kind: output, shape index: {1}]  }
   0x1   :  { %s596_s17 = smov 0  }
   0x2 LB: > { %s27_s18 = sadd.s32 1, %s560_s16  ;;  %p504_p0 = scmp.ge.s32.totalorder %s564_s17, 1  ;;  %s564_s17 = sphi %s596_s17, %s15_s17   ;;  %s560_s16 = sphi %s594_s16, %s681_s16   ;;  %s556_s15 = sphi %s592_s15, %s680_s15  }
   0x3   : > { %p29_p1 = scmp.ge.s32.totalorder %s27_s18, 2  ;;  %p196_p2 = scmp.lt.s32.totalorder %s564_s17, 3 }
   0x5   : > { %s683_s18 = smov (%p29_p1, %s27_s18), 0  ;;  %p197_p3 = pnand %p504_p0, %p196_p2 }
   0x6   : > { %p235_p4 = scmp.lt.s32.totalorder (!%p197_p3), %s556_s15, 1 }
   0x7   : > { %200 = sbr.rel (%p197_p3) target bundleno = 45 (0x2d), region = 32 }
   0xc   : > { %s685_s15 = smov (!%p235_p4, %s556_s15), 1  ;;  %v510_v0 = vld [vmem:[%s675_s0] ss:$0 sm:$0xff]  ;;  %v511_v1 = vld [vmem:[%s675_s0 + $0x1] ss:$0 sm:$0xff]  ;;  %vm298_vm0 = vcmask 1041408  }
   0xd   : > { %s516_s19 = sshll.u32 %s685_s15, 3  ;;  %s507_s20 = sshll.u32 %s685_s15, 1  ;;  %v512_v2 = vld [vmem:[%s675_s0 + $0x2] ss:$0 sm:$0xff]  ;;  %v513_v3 = vld [vmem:[%s675_s0 + $0x3] ss:$0 sm:$0xff] }
   0xe   : > { %s242_s25 = scalar_lea.vmem %s676_s1, %s516_s19  ;;  %s249_s28 = scalar_lea.vmem %s677_s2, %s507_s20  ;;  %v566_v8 = vmov 0.0   ;;  %vm331_vm5 = vcmask 1041409   ;;  %vm333_vm6 = vcmask 1042434   ;;  %vm335_vm7 = vcmask 1043459  }
   0xf   : > { %s508_s9 = sshll.u32 %s685_s15, 2  ;;  %v264_v4 = vld [vmem:[%s242_s25] sm:$0x3]  ;;  %v265_v5 = vld [vmem:[%s242_s25 + $0x2] sm:$0x3] }
  0x10   : > { %s631_s12 = scalar_lea.vmem %s678_s3, %s508_s9  ;;  %v266_v6 = vld [vmem:[%s242_s25 + $0x4] sm:$0x3]  ;;  %v268_v7 = vld [vmem:[%s249_s28] sm:$0x3]  ;;  %s636_s19 = scalar_lea.vmem %s679_s4, %s508_s9  ;;  %v267_v9 = vld [vmem:[%s242_s25 + $0x6] sm:$0x3] }
  0x11   : > { %262 = vst [vmem:[%s631_s12] sm:$0xf] %v566_v8  ;;  %vm289_vm1 = vcmp.eq.s32.totalorder %v268_v7, %v510_v0  ;;  %vm290_vm2 = vcmp.eq.s32.totalorder %v268_v7, %v511_v1  ;;  %vm291_vm3 = vcmp.eq.s32.totalorder %v268_v7, %v512_v2  ;;  %vm292_vm4 = vcmp.eq.s32.totalorder %v268_v7, %v513_v3 }
  0x12   : > { %263 = vst [vmem:[%s636_s19] sm:$0xf] %v566_v8  ;;  %v294_v10 = vsel %vm289_vm1, %v264_v4, 0.0  ;;  %v295_v11 = vsel %vm290_vm2, %v265_v5, 0.0  ;;  %v296_v12 = vsel %vm291_vm3, %v266_v6, 0.0  ;;  %v341_v13 = vadd.f32 1.0, %v264_v4 }
  0x13   : > { %v299_v14 = vsel %vm298_vm0, %v294_v10, 0.0  ;;  %v306_v15 = vsel %vm298_vm0, %v295_v11, 0.0  ;;  %v342_v16 = vadd.f32 1.0, %v265_v5  ;;  %v343_v17 = vadd.f32 1.0, %v266_v6 }
  0x14   : > { %v300_v18 = vrot.slane %v299_v14, 4  ;;  %v307_v19 = vrot.slane %v306_v15, 4  ;;  %v344_v20 = vadd.f32 1.0, %v267_v9  ;;  %v345_v21 = vsel %vm289_vm1, %v341_v13, %v264_v4 }
  0x15   : > { %v346_v22 = vsel %vm290_vm2, %v342_v16, %v265_v5  ;;  %v349_v23 = vsel %vm298_vm0, %v345_v21, 0.0  ;;  %v297_v24 = vsel %vm292_vm4, %v267_v9, 0.0  ;;  %v313_v25 = vsel %vm298_vm0, %v296_v12, 0.0 }
  0x16   : > { %v350_v26 = vrot.slane %v349_v23, 4  ;;  %v356_v27 = vsel %vm298_vm0, %v346_v22, 0.0  ;;  %v301_v28 = vadd.f32 %v300_v18, %v299_v14  ;;  %v308_v29 = vadd.f32 %v307_v19, %v306_v15 }
  0x17   : > { %v357_v30 = vrot.slane %v356_v27, 4  ;;  %v314_v31 = vrot.slane %v313_v25, 4  ;;  %v320_v32 = vsel %vm298_vm0, %v297_v24, 0.0  ;;  %v347_v33 = vsel %vm291_vm3, %v343_v17, %v266_v6 }
  0x18   : > { %v302_v34 = vrot.slane %v301_v28, 2  ;;  %v309_v35 = vrot.slane %v308_v29, 2  ;;  %v321_v36 = vrot.slane %v320_v32, 4  ;;  %v348_v37 = vsel %vm292_vm4, %v344_v20, %v267_v9  ;;  %v293_v9 = vld [vmem:[%s631_s12] sm:$0xf] }
  0x19   : > { %v315_v38 = vadd.f32 %v314_v31, %v313_v25  ;;  %v351_v39 = vadd.f32 %v350_v26, %v349_v23  ;;  %v358_v40 = vadd.f32 %v357_v30, %v356_v27  ;;  %v363_v41 = vsel %vm298_vm0, %v347_v33, 0.0  ;;  %v340_v20 = vld [vmem:[%s636_s19] sm:$0xf] }
  0x1a   : > { %v303_v42 = vadd.f32 %v302_v34, %v301_v28  ;;  %v310_v43 = vadd.f32 %v309_v35, %v308_v29  ;;  %v322_v44 = vadd.f32 %v321_v36, %v320_v32  ;;  %v364_v45 = vrot.slane %v363_v41, 4 }
  0x1b   : > { %v316_v46 = vrot.slane %v315_v38, 2  ;;  %v352_v47 = vrot.slane %v351_v39, 2  ;;  %v359_v48 = vrot.slane %v358_v40, 2  ;;  %v370_v49 = vsel %vm298_vm0, %v348_v37, 0.0 }
  0x1c   : > { %v304_v50 = vrot.slane %v303_v42, 1  ;;  %v311_v51 = vrot.slane %v310_v43, 1  ;;  %v323_v52 = vrot.slane %v322_v44, 2  ;;  %v365_v53 = vadd.f32 %v364_v45, %v363_v41 }
  0x1d   : > { %v317_v54 = vadd.f32 %v316_v46, %v315_v38  ;;  %v353_v55 = vadd.f32 %v352_v47, %v351_v39  ;;  %v360_v56 = vadd.f32 %v359_v48, %v358_v40  ;;  %v371_v57 = vrot.slane %v370_v49, 4 }
  0x1e   : > { %v305_v58 = vadd.f32 %v304_v50, %v303_v42  ;;  %v312_v59 = vadd.f32 %v311_v51, %v310_v43  ;;  %v324_v60 = vadd.f32 %v323_v52, %v322_v44  ;;  %v366_v61 = vrot.slane %v365_v53, 2 }
  0x1f   : > { %v318_v62 = vrot.slane %v317_v54, 1  ;;  %v354_v63 = vrot.slane %v353_v55, 1  ;;  %v361_v0 = vrot.slane %v360_v56, 1  ;;  %v372_v1 = vadd.f32 %v371_v57, %v370_v49 }
  0x20   : > { %v325_v2 = vrot.slane %v324_v60, 1  ;;  %v332_v3 = vsel %vm331_vm5, %v312_v59, %v305_v58  ;;  %v367_v4 = vadd.f32 %v366_v61, %v365_v53 }
  0x21   : > { %v319_v5 = vadd.f32 %v318_v62, %v317_v54  ;;  %v355_v6 = vadd.f32 %v354_v63, %v353_v55  ;;  %v362_v7 = vadd.f32 %v361_v0, %v360_v56  ;;  %v373_v8 = vrot.slane %v372_v1, 2 }
  0x22   : > { %v326_v10 = vadd.f32 %v325_v2, %v324_v60  ;;  %v368_v11 = vrot.slane %v367_v4, 1 }
  0x23   : > { %v334_v12 = vsel %vm333_vm6, %v319_v5, %v332_v3  ;;  %v374_v13 = vadd.f32 %v373_v8, %v372_v1  ;;  %v381_v14 = vsel %vm331_vm5, %v362_v7, %v355_v6 }
  0x24   : > { %v336_v15 = vsel %vm335_vm7, %v326_v10, %v334_v12  ;;  %v369_v16 = vadd.f32 %v368_v11, %v367_v4 }
  0x25   : > { %v338_v17 = vadd.f32 %v336_v15, %v293_v9  ;;  %v375_v18 = vrot.slane %v374_v13, 1 }
  0x26   : > { %v382_v19 = vsel %vm333_vm6, %v369_v16, %v381_v14 }
  0x27   : > { %339 = vst [vmem:[%s631_s12] sm:$0xf] %v338_v17  ;;  %v376_v21 = vadd.f32 %v375_v18, %v374_v13 }
  0x29   : > { %v383_v22 = vsel %vm335_vm7, %v376_v21, %v382_v19 }
  0x2a   : > { %v385_v23 = vadd.f32 %v383_v22, %v340_v20 }
  0x2c   : > { %386 = vst [vmem:[%s636_s19] sm:$0xf] %v385_v23 }
  0x2d PF: > { %s15_s17 = sadd.s32 1, %s564_s17   ;;  %s680_s15 = smov %s560_s16 }
  0x2e   : > { %p12_p5 = scmp.ge.s32.totalorder %s15_s17, 4   ;;  %s681_s16 = smov %s683_s18 }
  0x30   :  { %14 = sbr.rel (!%p12_p5) target bundleno = 2 (0x2), region = 81 }

</bundles_post_ra>
